<compile_context>
chip_gen: v5e
topology: v5e:2x2
jax: 0.10.0
libtpu: 0.0.40
codegen_flags: <defaults>
</compile_context>

<pallas_src>
import functools
import math

import jax
import jax.numpy as jnp
from jax.experimental import pallas as pl
from jax.experimental.pallas import tpu as pltpu


def _periodic_embed_kernel(x_ref, out_ref, *, lower, period_scale, n_np, n_out):
    """Elementwise hot path.

    x_ref / out_ref : (TB, width) tiles of the permuted (and possibly
    row-folded) input/output.  Column layout repeats with period n_out:
      lanes [0, n_np)        -> non-periodic passthrough
      lanes [n_np, n_out)    -> periodic feature duplicated; even offset = cos,
                                odd offset = sin (via cos(a - pi/2)).
    """
    x = x_ref[...]
    xf = x.astype(jnp.float32)

    feat = jax.lax.broadcasted_iota(jnp.int32, x.shape, dimension=1) % n_out
    is_periodic = feat >= n_np
    parity = jnp.bitwise_and(feat - n_np, 1).astype(jnp.float32)

    angle = (xf - lower) * period_scale - (0.5 * math.pi) * parity
    # TODO(synk): on v7x (HBM ~3.2 TB/s) the EUP/VPU slot may become binding;
    # if so, restrict the cos to the periodic lane slabs instead of the full tile.
    out = jnp.where(is_periodic, jnp.cos(angle), xf)
    out_ref[...] = out.astype(out_ref.dtype)


def _vmem_budget_bytes():
    """Chip-aware budget for the 4 double-buffered tiles (2 in + 2 out)."""
    try:
        cap = int(pltpu.get_tpu_info().vmem_capacity_bytes)
    except Exception:
        cap = 64 << 20  # conservative fallback (v7x per-TC physical VMEM)
    # ~1/4 of physical VMEM, clamped: 32 MiB on v5e/v6e (128 MiB), 16 MiB on v7x.
    return max(8 << 20, min(32 << 20, cap // 4))


def _plan(batch, n_out, itemsize, budget_bytes):
    """Pick (fold k, padded batch, rows, width, row tile tb)."""
    # Smallest k such that (k * n_out) % 128 == 0 -> unmasked full-lane stores.
    k = 128 // math.gcd(n_out, 128)
    if k > 1 and batch >= 8 * k:
        padded = pl.cdiv(batch, k) * k          # <= ~12.5% padding overhead
        rows, width = padded // k, k * n_out
    else:
        # Small batch (or n_out already 128-aligned): no fold.  If n_out is not
        # a multiple of 128 this falls back to masked stores, but the workload
        # is tiny in that regime.
        k, padded = 1, batch
        rows, width = batch, n_out

    per_row = max(1, width * itemsize)
    max_tb = budget_bytes // (4 * per_row)      # 2 in + 2 out buffers per tile
    max_tb = max(8, (max_tb // 8) * 8)

    if rows <= max_tb:
        if rows >= 16:
            # Keep at least 2 grid steps so the "parallel" axis can shard
            # across both TensorCores on v7x.
            tb = max(8, ((rows // 2) // 8) * 8)
        else:
            tb = rows                           # single full-extent block
    else:
        tb = max_tb
    return k, padded, rows, width, tb


class PeriodicEmbedding:
    """JAX/Pallas port of tfep's PeriodicEmbedding."""

    def __init__(self, n_features_in, limits, periodic_indices=None):
        self.n_features_in = int(n_features_in)
        self.limits = (float(limits[0]), float(limits[1]))

        if periodic_indices is None:
            periodic_indices = list(range(n_features_in))
        periodic_indices = [int(i) for i in periodic_indices]
        if len(set(periodic_indices)) < len(periodic_indices):
            raise ValueError('Found duplicated indices in periodic_indices.')

        periodic_set = set(periodic_indices)
        nonperiodic_indices = [i for i in range(self.n_features_in)
                               if i not in periodic_set]

        self._periodic_indices = jnp.asarray(periodic_indices, dtype=jnp.int32)
        self._nonperiodic_indices = jnp.asarray(nonperiodic_indices,
                                                dtype=jnp.int32)

        self._n_p = len(periodic_indices)
        self._n_np = len(nonperiodic_indices)
        self._n_out = self._n_np + 2 * self._n_p

        # Output-ordered gather: [nonperiodic..., p0, p0, p1, p1, ...]
        dup = []
        for p in periodic_indices:
            dup.extend((p, p))
        self._gather_indices = jnp.asarray(nonperiodic_indices + dup,
                                           dtype=jnp.int32)

    def __call__(self, x):
        batch_size, n_feat = x.shape
        assert n_feat == self.n_features_in
        n_out = self._n_out

        lower, upper = self.limits
        period_scale = 2.0 * math.pi / (upper - lower)

        itemsize = jnp.dtype(x.dtype).itemsize
        budget = _vmem_budget_bytes()
        k, padded, rows, width, tb = _plan(batch_size, n_out, itemsize, budget)

        # Static-index column gather into output order.  With
        # allow_input_fusion=[True] XLA may fuse this (and the pad / reshape)
        # into the pallas_call operand, avoiding the HBM intermediate.
        x_perm = jnp.take(x, self._gather_indices, axis=1)        # (B, n_out)
        if padded != batch_size:
            x_perm = jnp.pad(x_perm, ((0, padded - batch_size), (0, 0)))
        x_folded = x_perm.reshape(rows, width)

        kernel = functools.partial(
            _periodic_embed_kernel,
            lower=lower, period_scale=period_scale,
            n_np=self._n_np, n_out=n_out,
        )

        out_folded = pl.pallas_call(
            kernel,
            out_shape=jax.ShapeDtypeStruct((rows, width), x.dtype),
            grid=(pl.cdiv(rows, tb),),
            in_specs=[pl.BlockSpec((tb, width), lambda i: (i, 0))],
            out_specs=pl.BlockSpec((tb, width), lambda i: (i, 0)),
            compiler_params=pltpu.CompilerParams(
                dimension_semantics=("parallel",),
                vmem_limit_bytes=int(budget + (16 << 20)),
                allow_input_fusion=[True],
            ),
            cost_estimate=pl.CostEstimate(
                flops=4 * rows * width,
                transcendentals=rows * width,
                bytes_accessed=2 * rows * width * itemsize,
            ),
        )(x_folded)

        out = out_folded.reshape(padded, n_out)
        if padded != batch_size:
            out = out[:batch_size]
        return out

    def get_degrees_out(self, degrees_in):
        """Degrees after the forward pass (cos and sin inherit the input degree)."""
        nonper = jnp.take(degrees_in, self._nonperiodic_indices)
        per = jnp.take(degrees_in, self._periodic_indices)
        return jnp.concatenate([nonper, jnp.repeat(per, 2)])


def _reference_forward(x, limits, periodic_indices, nonperiodic_indices):
    """Pure-JAX reference mirroring the PyTorch forward."""
    batch_size = x.shape[0]
    lower, upper = limits
    period_scale = 2.0 * math.pi / (upper - lower)
    x_per = (x[:, periodic_indices] - lower) * period_scale
    parts = [x[:, nonperiodic_indices],
             jnp.stack([jnp.cos(x_per), jnp.sin(x_per)],
                       axis=2).reshape(batch_size, -1)]
    return jnp.concatenate(parts, axis=1)


if __name__ == "__main__":
    key = jax.random.PRNGKey(0)
    key_a, key_b, key_c = jax.random.split(key, 3)

    n_features_in = 8
    limits = (-math.pi, math.pi)
    periodic_indices = [1, 3, 6]
    emb = PeriodicEmbedding(n_features_in, limits, periodic_indices)
    n_out = n_features_in + len(periodic_indices)   # 11

    # 1) Tiny batch: no fold, single full-extent block.
    x = jax.random.uniform(key_a, (2, n_features_in), jnp.float32,
                           minval=-3.0, maxval=3.0)
    out = jax.block_until_ready(emb(x))
    ref = _reference_forward(x, limits, emb._periodic_indices,
                             emb._nonperiodic_indices)
    assert out.shape == (2, n_out), out.shape
    assert jnp.allclose(out, ref, atol=1e-5, rtol=1e-5)

    # 2) Mid batch: narrow fallback path, grid split into >= 2 steps.
    x2 = jax.random.uniform(key_b, (256, n_features_in), jnp.float32,
                            minval=-3.0, maxval=3.0)
    out2 = jax.block_until_ready(emb(x2))
    ref2 = _reference_forward(x2, limits, emb._periodic_indices,
                              emb._nonperiodic_indices)
    assert out2.shape == (256, n_out)
    assert jnp.allclose(out2, ref2, atol=1e-5, rtol=1e-5)

    # 3) Large batch: lane-fold path (k = 128, batch padded 1040 -> 1152,
    #    width 1408 = multiple of 128 -> unmasked stores).
    x3 = jax.random.uniform(key_c, (1040, n_features_in), jnp.float32,
                            minval=-3.0, maxval=3.0)
    out3 = jax.block_until_ready(emb(x3))
    ref3 = _reference_forward(x3, limits, emb._periodic_indices,
                              emb._nonperiodic_indices)
    assert out3.shape == (1040, n_out)
    assert jnp.allclose(out3, ref3, atol=1e-5, rtol=1e-5)

    print("KERNEL_OK")
</pallas_src>

<mosaic_0001>
module attributes {stable_mosaic.version = 11 : i64} {
  func.func @_periodic_embed_kernel(%arg0: i32, %arg1: memref<2x11xf32, #tpu.memory_space<vmem>>, %arg2: memref<2x11xf32, #tpu.memory_space<vmem>>) attributes {dimension_semantics = [#tpu.dimension_semantics<parallel>], iteration_bounds = array<i64: 1>, scalar_prefetch = 0 : i64, scratch_operands = 0 : i64, tpu.core_type = #tpu.core_type<tc>, window_params = [{transform_indices = @transform_0, window_bounds = array<i64: 2, 11>}, {transform_indices = @transform_1, window_bounds = array<i64: 2, 11>}]} {
    %c0 = arith.constant 0 : index
    %c0_0 = arith.constant 0 : index
    %0 = vector.load %arg1[%c0, %c0_0] : memref<2x11xf32, #tpu.memory_space<vmem>>, vector<2x11xf32>
    %1 = tpu.iota {dimensions = array<i32: 1>} : vector<2x11xi32>
    %c11_i32 = arith.constant 11 : i32
    %c0_i32 = arith.constant 0 : i32
    %2 = arith.cmpi eq, %c11_i32, %c0_i32 : i32
    %c1_i32 = arith.constant 1 : i32
    %3 = arith.select %2, %c1_i32, %c11_i32 : i32
    %4 = vector.broadcast %3 : i32 to vector<2x11xi32>
    %5 = arith.remsi %1, %4 : vector<2x11xi32>
    %c0_i32_1 = arith.constant 0 : i32
    %6 = vector.broadcast %c0_i32_1 : i32 to vector<2x11xi32>
    %7 = arith.cmpi ne, %5, %6 : vector<2x11xi32>
    %c0_i32_2 = arith.constant 0 : i32
    %8 = vector.broadcast %c0_i32_2 : i32 to vector<2x11xi32>
    %9 = arith.cmpi slt, %5, %8 : vector<2x11xi32>
    %c0_i32_3 = arith.constant 0 : i32
    %10 = arith.cmpi slt, %3, %c0_i32_3 : i32
    %11 = vector.broadcast %10 : i1 to vector<2x11xi1>
    %12 = vector.broadcast %11 : vector<2x11xi1> to vector<2x11xi1>
    %13 = arith.xori %9, %12 : vector<2x11xi1>
    %14 = arith.andi %13, %7 : vector<2x11xi1>
    %15 = vector.broadcast %3 : i32 to vector<2x11xi32>
    %16 = arith.addi %5, %15 : vector<2x11xi32>
    %17 = arith.select %14, %16, %5 : vector<2x11xi1>, vector<2x11xi32>
    %c5_i32 = arith.constant 5 : i32
    %18 = vector.broadcast %c5_i32 : i32 to vector<2x11xi32>
    %19 = arith.cmpi sge, %17, %18 : vector<2x11xi32>
    %c5_i32_4 = arith.constant 5 : i32
    %20 = vector.broadcast %c5_i32_4 : i32 to vector<2x11xi32>
    %21 = arith.subi %17, %20 : vector<2x11xi32>
    %c1_i32_5 = arith.constant 1 : i32
    %22 = vector.broadcast %c1_i32_5 : i32 to vector<2x11xi32>
    %23 = arith.andi %21, %22 : vector<2x11xi32>
    %24 = arith.sitofp %23 : vector<2x11xi32> to vector<2x11xf32>
    %cst = arith.constant -3.14159274 : f32
    %25 = vector.broadcast %cst : f32 to vector<2x11xf32>
    %26 = arith.subf %0, %25 : vector<2x11xf32>
    %cst_6 = arith.constant 1.000000e+00 : f32
    %27 = vector.broadcast %cst_6 : f32 to vector<2x11xf32>
    %28 = arith.mulf %26, %27 : vector<2x11xf32>
    %cst_7 = arith.constant 1.57079637 : f32
    %29 = vector.broadcast %cst_7 : f32 to vector<2x11xf32>
    %30 = arith.mulf %29, %24 : vector<2x11xf32>
    %31 = arith.subf %28, %30 : vector<2x11xf32>
    %32 = math.cos %31 : vector<2x11xf32>
    %33 = arith.select %19, %32, %0 : vector<2x11xi1>, vector<2x11xf32>
    %c0_8 = arith.constant 0 : index
    %c0_9 = arith.constant 0 : index
    %34 = vector.load %arg2[%c0_8, %c0_9] : memref<2x11xf32, #tpu.memory_space<vmem>>, vector<2x11xf32>
    tpu.vector_store %arg2[%c0_8, %c0_9], %33 {strides = array<i32>} : memref<2x11xf32, #tpu.memory_space<vmem>>, vector<2x11xf32>,
    return
  }
  func.func @transform_0(%arg0: i32) -> (i32, i32) {
    %c0_i32 = arith.constant 0 : i32
    %c0_i32_0 = arith.constant 0 : i32
    return %arg0, %c0_i32 : i32, i32
  }
  func.func @transform_1(%arg0: i32) -> (i32, i32) {
    %c0_i32 = arith.constant 0 : i32
    %c0_i32_0 = arith.constant 0 : i32
    return %arg0, %c0_i32 : i32, i32
  }
}

</mosaic_0001>

<bundles_post_ra>
// kernel: tpu_custom_call.1
= control target key start
LH: loop header
LB: loop body
LE: loop exit
PB: predicated region body
PF: predicated region fallthrough
CT: control target
= control target key end

     0   :  { %6 = vsyncpa [#allocation3], 0  ;;  %s400_s0 = inlined_call_operand.hbm [shape: f32[2,11], index: 0, kind: input, shape index: {}]   ;;  %s401_s1 = inlined_call_operand.hbm [shape: f32[2,11], index: 1, kind: output, shape index: {}]  }
   0x1   :  { %7 = vsyncpa [#allocation4], 0  ;;  %s13_s8 = sshll.u32 %s400_s0, 4  ;;  %s307_s9 = smov [#allocation2]   ;;  %s14_s8 = int_to_ptr.hbm [resolvable:$true] %s13_s8 }
   0x2   :  { %s15_s10 = sshll.u32 %s307_s9, 4  ;;  %s16_s10 = int_to_ptr.vmem [resolvable:$true] %s15_s10 }
   0x3   :  { %18 = dma.hbm_to_vmem [thread:$0]  %s14_s8, 32, %s16_s10, [#allocation3]  }
   0x4   :  { %303 = dma.done.wait [#allocation3], 32  }
   0x5   :  { %304 = vsyncadd [#allocation3], 4294967264  ;;  %v24_v0 = vlaneseq  ;;  %v308_v11 = vmov 0   ;;  %v334_v26 = vld [vmem:[#allocation2] sm:$0x3]  ;;  %s315_s0 = smov [#allocation5]  }
   0x6   :  { %v242_v29 = vadd.f32 3.1415927, %v334_v26  ;;  %v309_v43 = vmov 683565275   ;;  %v310_v45 = vmov 2475754826  }
   0x7   :  { %v25_v1 = vand.u32 127, %v24_v0  ;;  %v311_v47 = vmov 2131351028   ;;  %v312_v49 = vmov 2102212464   ;;  %s229_s11 = sshll.u32 %s315_s0, 4  ;;  %s230_s11 = int_to_ptr.vmem [resolvable:$true] %s229_s11 }
   0x8   :  { %v313_v51 = vmov 920167782   ;;  %v314_v57 = vmov 1326507024   ;;  %s231_s14 = sshll.u32 %s401_s1, 4  ;;  %s232_s14 = int_to_ptr.hbm [resolvable:$true] %s231_s14 }
   0x9   :  { %v29_v2 = vand.u32 65535, %v25_v1  ;;  %v30_v3 = vshrl.u32 %v25_v1, 16 }
   0xb   :  { %v32_v4 = vmul.u32 35747, %v29_v2  ;;  %v33_v5 = vmul.u32 47662, %v29_v2  ;;  %v34_v6 = vmul.u32 35747, %v30_v3  ;;  %v35_v7 = vmul.u32 47662, %v30_v3 }
   0xd   :  { %v36_v8 = vshll.u32 %v33_v5, 16  ;;  %v38_v9 = vshll.u32 %v34_v6, 16  ;;  %v37_v13 = vshrl.u32 %v33_v5, 16  ;;  %v39_v16 = vshrl.u32 %v34_v6, 16 }
   0xf   :  { %vm40_vm0 = vc.u32 %v32_v4, %v36_v8  ;;  %v42_v10 = vadd.s32 %v36_v8, %v32_v4 }
  0x10   :  { %v41_v12 = vsel %vm40_vm0, 1, %v308_v11 }
  0x11   :  { %v43_v14 = vadd.s32 %v41_v12, %v35_v7  ;;  %vm44_vm1 = vc.u32 %v42_v10, %v38_v9 }
  0x12   :  { %v45_v15 = vsel %vm44_vm1, 1, %v308_v11 }
  0x13   :  { %v47_v17 = vadd.s32 %v45_v15, %v43_v14 }
  0x15   :  { %v48_v18 = vadd.s32 %v47_v17, %v37_v13 }
  0x17   :  { %v49_v19 = vadd.s32 %v48_v18, %v39_v16 }
  0x19   :  { %v50_v20 = vshrl.u32 %v49_v19, 3 }
  0x1b   :  { %v51_v21 = vmul.u32 11, %v50_v20 }
  0x1d   :  { %v52_v22 = vsub.s32 %v25_v1, %v51_v21 }
  0x1f   :  { %vm55_vm2 = vcmp.ne.s32.totalorder %v52_v22, 0  ;;  %vm56_vm3 = vcmp.lt.s32.totalorder %v52_v22, 0  ;;  %v58_v23 = vadd.s32 11, %v52_v22 }
  0x20   :  { %vm57_vm4 = vmand %vm56_vm3, %vm55_vm2 }
  0x21   :  { %v331_v24 = vsel %vm57_vm4, %v58_v23, %v52_v22 }
  0x22   :  { %v241_v25 = vadd.s32 4294967291, %v331_v24 }
  0x24   :  { %v62_v27 = vand.u32 1, %v241_v25 }
  0x26   :  { %v63_v28 = vcvt.s32.f32 %v62_v27 }
  0x28   :  { %v65_v30 = vmul.f32 1.5707964, %v63_v28 }
  0x2a   :  { %v337_v31 = vsub.f32 %v242_v29, %v65_v30 }
  0x2c   :  { %v70_v32 = vand.u32 2139095040, %v337_v31  ;;  %v67_v34 = vand.u32 2147483647, %v337_v31  ;;  %vm69_vm1 = vcmp.lt.s32.totalorder %v337_v31, 0 }
  0x2e   :  { %v71_v33 = vshrl.u32 %v70_v32, 23  ;;  %v74_v37 = vand.u32 8388607, %v67_v34  ;;  %vm385_vm2 = vcmp.le.f32.partialorder %v67_v34, 0.7853982 }
  0x30   :  { %v243_v35 = vadd.s32 4294967169, %v71_v33  ;;  %v75_v40 = vor.u32 8388608, %v74_v37 }
  0x32   :  { %v77_v36 = vadd.s32 1, %v243_v35  ;;  %v346_v59 = vshll.u32 %v75_v40, 8 }
  0x34   :  { %vm78_vm5 = vcmp.gt.s32.totalorder %v77_v36, 0  ;;  %v116_v7 = vand.u32 65535, %v346_v59  ;;  %v117_v8 = vshrl.u32 %v346_v59, 16 }
  0x35   :  { %v79_v38 = vsel %vm78_vm5, %v77_v36, 0 }
  0x36   :  { %v81_v39 = vand.u32 31, %v79_v38  ;;  %v343_v41 = vshrl.u32 %v79_v38, 5 }
  0x38   :  { %v82_v42 = vsub.s32 32, %v81_v39  ;;  %v84_v44 = vshll.u32 %v309_v43, %v81_v39  ;;  %v87_v46 = vshll.u32 %v310_v45, %v81_v39  ;;  %v90_v48 = vshll.u32 %v311_v47, %v81_v39 }
  0x39   :  { %v93_v50 = vshll.u32 %v312_v49, %v81_v39  ;;  %v96_v52 = vshll.u32 %v313_v51, %v81_v39  ;;  %vm99_vm6 = vcmp.lt.s32.totalorder %v343_v41, 1  ;;  %vm102_vm7 = vcmp.lt.s32.totalorder %v343_v41, 4 }
  0x3a   :  { %v85_v53 = vshrl.u32 %v310_v45, %v82_v42  ;;  %v88_v54 = vshrl.u32 %v311_v47, %v82_v42  ;;  %v91_v55 = vshrl.u32 %v312_v49, %v82_v42  ;;  %v94_v56 = vshrl.u32 %v313_v51, %v82_v42 }
  0x3b   :  { %v97_v58 = vshrl.u32 %v314_v57, %v82_v42  ;;  %vm101_vm8 = vcmp.lt.s32.totalorder %v343_v41, 3  ;;  %vm100_vm9 = vcmp.lt.s32.totalorder %v343_v41, 2  ;;  %v83_v16 = vshrl.u32 %v309_v43, %v82_v42 }
  0x3c   :  { %v86_v60 = vor.u32 %v85_v53, %v84_v44  ;;  %v89_v61 = vor.u32 %v88_v54, %v87_v46  ;;  %v92_v62 = vor.u32 %v91_v55, %v90_v48  ;;  %v95_v63 = vor.u32 %v94_v56, %v93_v50 }
  0x3d   :  { %v98_v0 = vor.u32 %v97_v58, %v96_v52 }
  0x3e   :  { %v107_v1 = vsel %vm99_vm6, %v86_v60, %v89_v61  ;;  %v111_v2 = vsel %vm99_vm6, %v89_v61, %v92_v62  ;;  %v108_v3 = vsel %vm102_vm7, %v95_v63, 920167782  ;;  %v103_v32 = vsel %vm99_vm6, %v83_v16, %v86_v60 }
  0x3f   :  { %v112_v4 = vsel %vm102_vm7, %v98_v0, 1326507024  ;;  %v109_v5 = vsel %vm101_vm8, %v92_v62, %v108_v3  ;;  %v104_v35 = vsel %vm102_vm7, %v92_v62, 2102212464  ;;  %vm210_vm6 = vweird.f32 %v337_v31 }
  0x40   :  { %v113_v6 = vsel %vm101_vm8, %v95_v63, %v112_v4  ;;  %v110_v9 = vsel %vm100_vm9, %v107_v1, %v109_v5  ;;  %v105_v45 = vsel %vm101_vm8, %v89_v61, %v104_v35  ;;  %vm60_vm7 = vcmp.ge.s32.totalorder %v331_v24, 5 }
  0x41   :  { %v114_v10 = vsel %vm100_vm9, %v111_v2, %v113_v6  ;;  %v140_v14 = vand.u32 65535, %v110_v9  ;;  %v141_v15 = vshrl.u32 %v110_v9, 16  ;;  %v106_v53 = vsel %vm100_vm9, %v103_v32, %v105_v45 }
  0x42   :  { %v118_v12 = vand.u32 65535, %v114_v10  ;;  %v119_v13 = vshrl.u32 %v114_v10, 16  ;;  %v160_v57 = vmul.u32 %v346_v59, %v106_v53  ;;  %vm222_vm8 = vcmask 82944  }
  0x43   :  { %v142_v20 = vmul.u32 %v140_v14, %v116_v7  ;;  %v143_v21 = vmul.u32 %v141_v15, %v116_v7  ;;  %v144_v22 = vmul.u32 %v140_v14, %v117_v8  ;;  %v145_v28 = vmul.u32 %v141_v15, %v117_v8 }
  0x44   :  { %v120_v17 = vmul.u32 %v118_v12, %v116_v7  ;;  %v121_v18 = vmul.u32 %v119_v13, %v116_v7  ;;  %v122_v19 = vmul.u32 %v118_v12, %v117_v8  ;;  %v123_v23 = vmul.u32 %v119_v13, %v117_v8 }
  0x45   :  { %v146_v29 = vshll.u32 %v143_v21, 16  ;;  %v148_v30 = vshll.u32 %v144_v22, 16  ;;  %v147_v43 = vshrl.u32 %v143_v21, 16  ;;  %v149_v49 = vshrl.u32 %v144_v22, 16 }
  0x46   :  { %v124_v25 = vshll.u32 %v121_v18, 16  ;;  %v126_v27 = vshll.u32 %v122_v19, 16  ;;  %v125_v38 = vshrl.u32 %v121_v18, 16  ;;  %v127_v46 = vshrl.u32 %v122_v19, 16 }
  0x47   :  { %vm150_vm11 = vc.u32 %v142_v20, %v146_v29  ;;  %v152_v37 = vadd.s32 %v146_v29, %v142_v20 }
  0x48   :  { %vm128_vm10 = vc.u32 %v120_v17, %v124_v25  ;;  %v130_v33 = vadd.s32 %v124_v25, %v120_v17  ;;  %v151_v40 = vsel %vm150_vm11, 1, %v308_v11 }
  0x49   :  { %v129_v36 = vsel %vm128_vm10, 1, %v308_v11  ;;  %v153_v44 = vadd.s32 %v151_v40, %v145_v28  ;;  %vm154_vm13 = vc.u32 %v152_v37, %v148_v30  ;;  %v156_v52 = vadd.s32 %v152_v37, %v148_v30 }
  0x4a   :  { %v131_v39 = vadd.s32 %v129_v36, %v123_v23  ;;  %vm132_vm12 = vc.u32 %v130_v33, %v126_v27  ;;  %v155_v48 = vsel %vm154_vm13, 1, %v308_v11 }
  0x4b   :  { %v133_v42 = vsel %vm132_vm12, 1, %v308_v11  ;;  %v157_v50 = vadd.s32 %v155_v48, %v153_v44 }
  0x4c   :  { %v135_v47 = vadd.s32 %v133_v42, %v131_v39 }
  0x4d   :  { %v158_v54 = vadd.s32 %v157_v50, %v147_v43 }
  0x4e   :  { %v136_v51 = vadd.s32 %v135_v47, %v125_v38 }
  0x4f   :  { %v159_v56 = vadd.s32 %v158_v54, %v149_v49 }
  0x50   :  { %v137_v55 = vadd.s32 %v136_v51, %v127_v46 }
  0x51   :  { %v163_v58 = vadd.s32 1, %v159_v56 }
  0x52   :  { %vm162_vm14 = vc.u32 %v137_v55, %v156_v52  ;;  %v161_v41 = vadd.s32 %v156_v52, %v137_v55 }
  0x53   :  { %v164_v60 = vsel %vm162_vm14, %v163_v58, %v159_v56 }
  0x54   :  { %v165_v61 = vadd.s32 %v164_v60, %v160_v57 }
  0x56   :  { %v166_v62 = vadd.s32 536870912, %v165_v61 }
  0x58   :  { %v167_v63 = vshrl.u32 %v166_v62, 30 }
  0x5a   :  { %v168_v0 = vshll.u32 %v167_v63, 30  ;;  %v191_v20 = vsub.s32 4, %v167_v63 }
  0x5c   :  { %v169_v11 = vsub.s32 %v165_v61, %v168_v0  ;;  %v192_v27 = vsel %vm69_vm1, %v191_v20, %v167_v63 }
  0x5d   :  { %v194_v30 = vsel %vm385_vm2, 0, %v192_v27 }
  0x5e   :  { %vm170_vm15 = vcmp.lt.s32.totalorder %v169_v11, 0  ;;  %v171_v1 = vsub.s32 0, %v169_v11  ;;  %v211_v36 = vand.u32 3, %v194_v30 }
  0x60   :  { %v172_v2 = vsel %vm170_vm15, %v171_v1, %v169_v11  ;;  %vm216_vm3 = vcmp.eq.s32.totalorder %v211_v36, 2  ;;  %vm213_vm4 = vcmp.eq.s32.totalorder %v211_v36, 0  ;;  %vm212_vm5 = vcmp.lt.s32.totalorder %v211_v36, 2 }
  0x61   :  { %v173_v3 = vclz %v172_v2 }
  0x63   :  { %v244_v4 = vadd.s32 4294967294, %v173_v3 }
  0x65   :  { %vm245_vm0 = vcmp.lt.s32.totalorder %v244_v4, 0 }
  0x66   :  { %v176_v5 = vsel %vm245_vm0, 0, %v244_v4 }
  0x67   :  { %v177_v6 = vsub.s32 32, %v176_v5  ;;  %v178_v7 = vshll.u32 %v169_v11, %v176_v5  ;;  %v181_v8 = vsub.s32 4294967266, %v176_v5 }
  0x69   :  { %v179_v59 = vshrl.u32 %v161_v41, %v177_v6  ;;  %v182_v9 = vadd.s32 127, %v181_v8 }
  0x6b   :  { %v180_v10 = vor.u32 %v179_v59, %v178_v7  ;;  %v183_v12 = vshll.u32 %v182_v9, 23 }
  0x6d   :  { %v184_v13 = vor.u32 4788187, %v183_v12  ;;  %v187_v14 = vcvt.s32.f32 %v180_v10 }
  0x6f   :  { %v185_v15 = vand.u32 2147483647, %v184_v13 }
  0x71   :  { %v188_v16 = vmul.f32 %v187_v14, %v185_v15 }
  0x73   :  { %v189_v18 = vxor.u32 2147483648, %v188_v16 }
  0x75   :  { %v190_v19 = vsel %vm69_vm1, %v189_v18, %v188_v16 }
  0x76   :  { %v193_v21 = vsel %vm385_vm2, %v337_v31, %v190_v19 }
  0x77   :  { %v195_v22 = vmul.f32 %v193_v21, %v193_v21 }
  0x79   :  { %v196_v23 = vmul.f32 -0.001358992, %v195_v22  ;;  %v203_v25 = vmul.f32 -0.00019511016, %v195_v22 }
  0x7b   :  { %v197_v28 = vadd.f32 0.041655596, %v196_v23  ;;  %v204_v29 = vadd.f32 0.008332121, %v203_v25 }
  0x7d   :  { %v198_v34 = vmul.f32 %v197_v28, %v195_v22  ;;  %v205_v32 = vmul.f32 %v204_v29, %v195_v22 }
  0x7f   :  { %v199_v33 = vadd.f32 -0.4999988, %v198_v34  ;;  %v206_v35 = vadd.f32 -0.16666654, %v205_v32 }
  0x81   :  { %v200_v37 = vmul.f32 %v199_v33, %v195_v22  ;;  %v207_v38 = vmul.f32 %v206_v35, %v195_v22 }
  0x83   :  { %v201_v39 = vadd.f32 1.0, %v200_v37  ;;  %v208_v40 = vadd.f32 1.0, %v207_v38 }
  0x85   :  { %v209_v42 = vmul.f32 %v208_v40, %v193_v21  ;;  %v217_v43 = vxor.u32 2147483648, %v201_v39 }
  0x87   :  { %v214_v44 = vxor.u32 2147483648, %v209_v42  ;;  %v218_v45 = vsel %vm216_vm3, %v217_v43, %v209_v42 }
  0x89   :  { %v215_v46 = vsel %vm213_vm4, %v201_v39, %v214_v44 }
  0x8a   :  { %v219_v47 = vsel %vm212_vm5, %v215_v46, %v218_v45 }
  0x8b   :  { %v220_v48 = vsel %vm210_vm6, nan, %v219_v47 }
  0x8c   :  { %v221_v49 = vsel %vm60_vm7, %v220_v48, %v334_v26 }
  0x8d   :  { %223 = vst.msk [vmem:[#allocation5] sm:$0x3] %vm222_vm8, %v221_v49 }
  0x8e   :  { %234 = dma.vmem_to_hbm [thread:$0]  %s230_s11, 32, %s232_s14, [#allocation4]  }
  0x8f   :  { %305 = dma.done.wait [#allocation4], 32  }
  0x90   :  { %306 = vsyncadd [#allocation4], 4294967264 }
  0x91   :  { %239 = vsyncpa [#allocation3], 1 }
  0x92   :  { %240 = vsyncpa [#allocation4], 1 }

</bundles_post_ra>
